<compile_context>
chip_gen: v5e
topology: v5e:2x2
jax: 0.10.0
libtpu: 0.0.40
codegen_flags: <defaults>
</compile_context>

<pallas_src>
import jax
import jax.numpy as jnp
from jax.experimental import pallas as pl
from jax.experimental.pallas import tpu as pltpu

IN_DIM = 784
HID_DIM = 5
DEFAULT_TILE_B = 2048          # rows per grid step; multiple of 8
DEFAULT_VMEM_LIMIT = 40 << 20  # bytes; > v5e's 16 MiB default, < v7x's 64 MiB physical


def mlp_kernel(x_ref, w1_ref, b1_ref, w2_ref, b2_ref, w3_ref, b3_ref, o_ref):
    # x_ref: [TILE_B, 784] in its incoming dtype (f32); weights pre-transposed
    # [in, out] bf16; biases [1, out] f32; output [TILE_B, 10] f32.

    # fc1 + ReLU.  Cast the streamed tile to bf16 right before the MXU matmul
    # (VPU work hidden under the next tile's DMA); accumulate in f32.
    x_bf16 = x_ref[...].astype(jnp.bfloat16)
    h1 = jnp.dot(x_bf16, w1_ref[...], preferred_element_type=jnp.float32)
    h1 = jnp.maximum(h1 + b1_ref[...], 0.0)

    # fc2 + ReLU
    h2 = jnp.dot(h1.astype(w2_ref.dtype), w2_ref[...],
                 preferred_element_type=jnp.float32)
    h2 = jnp.maximum(h2 + b2_ref[...], 0.0)

    # fc3 (no activation)
    out = jnp.dot(h2.astype(w3_ref.dtype), w3_ref[...],
                  preferred_element_type=jnp.float32)
    o_ref[...] = (out + b3_ref[...]).astype(o_ref.dtype)


def mnist_mlp_relu1_forward(x, params, *, tile_b=DEFAULT_TILE_B,
                            vmem_limit_bytes=DEFAULT_VMEM_LIMIT):
    """x: any shape whose trailing dims flatten to [B, 784] (e.g. NCHW MNIST).

    params = (w1t, b1, w2t, b2, w3t, b3) with weights stored transposed
    ([in, out]) relative to nn.Linear's [out, in], biases shaped [1, out].
    Returns f32 logits [B, 10].
    """
    w1t, b1, w2t, b2, w3t, b3 = params
    in_dim = w1t.shape[0]
    out_dim = w3t.shape[1]

    # == torch x.view(-1, 784); x keeps its incoming dtype (no wrapper cast).
    x2d = x.reshape(-1, in_dim)
    batch = x2d.shape[0]

    # Pad only to a sublane multiple (<= 7 extra rows) -- no per-tile padding.
    padded_b = ((batch + 7) // 8) * 8
    if padded_b != batch:
        x2d = jnp.pad(x2d, ((0, padded_b - batch), (0, 0)))

    # Batch tile: as large as requested, never larger than the padded batch,
    # always a multiple of 8 sublanes.  The grid uses cdiv, so the last tile
    # may be partial; Pallas masks its loads/stores (rows are independent).
    tb = max(8, min(int(tile_b), padded_b))
    tb = ((tb + 7) // 8) * 8
    grid = (pl.cdiv(padded_b, tb),)

    # Tiny weights -> bf16 once in the wrapper (negligible); biases stay f32.
    w1_bf16 = w1t.astype(jnp.bfloat16)
    w2_bf16 = w2t.astype(jnp.bfloat16)
    w3_bf16 = w3t.astype(jnp.bfloat16)
    b1f = b1.astype(jnp.float32).reshape(1, HID_DIM)
    b2f = b2.astype(jnp.float32).reshape(1, HID_DIM)
    b3f = b3.astype(jnp.float32).reshape(1, out_dim)

    const = lambda i: (0, 0)  # weights/biases resident across batch tiles

    x_bytes_per_elem = jnp.dtype(x2d.dtype).itemsize
    flops = 2 * padded_b * (in_dim * HID_DIM + HID_DIM * HID_DIM
                            + HID_DIM * out_dim)
    bytes_accessed = (
        padded_b * in_dim * x_bytes_per_elem          # x stream (read)
        + padded_b * out_dim * 4                      # logits f32 (write)
        + (in_dim * HID_DIM + HID_DIM * HID_DIM + HID_DIM * out_dim) * 2
        + (2 * HID_DIM + out_dim) * 4                 # biases
    )

    out = pl.pallas_call(
        mlp_kernel,
        out_shape=jax.ShapeDtypeStruct((padded_b, out_dim), jnp.float32),
        grid=grid,
        in_specs=[
            pl.BlockSpec((tb, in_dim), lambda i: (i, 0)),   # x: streamed per tile
            pl.BlockSpec((in_dim, HID_DIM), const),         # w1t
            pl.BlockSpec((1, HID_DIM), const),              # b1
            pl.BlockSpec((HID_DIM, HID_DIM), const),        # w2t
            pl.BlockSpec((1, HID_DIM), const),              # b2
            pl.BlockSpec((HID_DIM, out_dim), const),        # w3t
            pl.BlockSpec((1, out_dim), const),              # b3
        ],
        out_specs=pl.BlockSpec((tb, out_dim), lambda i: (i, 0)),
        compiler_params=pltpu.CompilerParams(
            dimension_semantics=("parallel",),
            vmem_limit_bytes=vmem_limit_bytes),
        cost_estimate=pl.CostEstimate(
            flops=flops, transcendentals=0, bytes_accessed=bytes_accessed),
    )(x2d, w1_bf16, b1f, w2_bf16, b2f, w3_bf16, b3f)

    return out[:batch]


def init_params(key, layer_sizes=(784, 10)):
    """Deterministic init matching nn.Linear shapes.

    PyTorch stores Linear weight as [out, in]; we keep the transposed [in, out]
    form for the kernel.  Biases kept 2D ([1, out]) for TPU-friendly layout.
    """
    d_in, d_out = layer_sizes
    k1, k2, k3, k4, k5, k6 = jax.random.split(key, 6)

    def uinit(k, shape, fan_in):
        bound = 1.0 / jnp.sqrt(fan_in)
        return jax.random.uniform(k, shape, jnp.float32, -bound, bound)

    w1t = uinit(k1, (d_in, HID_DIM), d_in)        # fc1.weight.T
    b1 = uinit(k2, (1, HID_DIM), d_in)            # fc1.bias
    w2t = uinit(k3, (HID_DIM, HID_DIM), HID_DIM)  # fc2.weight.T
    b2 = uinit(k4, (1, HID_DIM), HID_DIM)         # fc2.bias
    w3t = uinit(k5, (HID_DIM, d_out), HID_DIM)    # fc3.weight.T
    b3 = uinit(k6, (1, d_out), HID_DIM)           # fc3.bias
    return (w1t, b1, w2t, b2, w3t, b3)


def _reference(x, params):
    """Pure-JAX reference applying the same bf16 weight/activation casts as the
    kernel (f32 MXU accumulation), for an apples-to-apples comparison."""
    w1t, b1, w2t, b2, w3t, b3 = params
    x2d = x.reshape(-1, IN_DIM).astype(jnp.bfloat16)
    h1 = jnp.maximum(
        jnp.dot(x2d, w1t.astype(jnp.bfloat16),
                preferred_element_type=jnp.float32) + b1, 0.0)
    h2 = jnp.maximum(
        jnp.dot(h1.astype(jnp.bfloat16), w2t.astype(jnp.bfloat16),
                preferred_element_type=jnp.float32) + b2, 0.0)
    return jnp.dot(h2.astype(jnp.bfloat16), w3t.astype(jnp.bfloat16),
                   preferred_element_type=jnp.float32) + b3


if __name__ == "__main__":
    key = jax.random.PRNGKey(0)
    kx1, kx2, kp = jax.random.split(key, 3)
    params = init_params(kp, layer_sizes=(784, 10))

    # Case 1: MNIST-like NCHW batch whose size is NOT a multiple of 8
    # (exercises the sublane-pad path), default tile.
    x1 = jax.random.normal(kx1, (10, 1, 28, 28), dtype=jnp.float32)
    out1 = jax.block_until_ready(mnist_mlp_relu1_forward(x1, params))
    assert out1.shape == (10, 10) and out1.dtype == jnp.float32
    ref1 = _reference(x1, params)
    assert jnp.allclose(out1, ref1, atol=1e-2, rtol=1e-2), (
        "case1 max abs err = %s" % jnp.max(jnp.abs(out1 - ref1)))

    # Case 2: multi-tile grid with a partial last tile (batch=20, tile_b=16,
    # padded to 24 rows -> grid=2, second tile ragged), exercises cdiv path.
    x2 = jax.random.normal(kx2, (20, 1, 28, 28), dtype=jnp.float32)
    out2 = jax.block_until_ready(mnist_mlp_relu1_forward(x2, params, tile_b=16))
    assert out2.shape == (20, 10) and out2.dtype == jnp.float32
    ref2 = _reference(x2, params)
    assert jnp.allclose(out2, ref2, atol=1e-2, rtol=1e-2), (
        "case2 max abs err = %s" % jnp.max(jnp.abs(out2 - ref2)))

    print("KERNEL_OK")
</pallas_src>

<mosaic_0001>
module attributes {stable_mosaic.version = 11 : i64} {
  func.func @mlp_kernel(%arg0: i32, %arg1: memref<16x784xf32, #tpu.memory_space<vmem>>, %arg2: memref<784x5xbf16, #tpu.memory_space<vmem>>, %arg3: memref<1x5xf32, #tpu.memory_space<vmem>>, %arg4: memref<5x5xbf16, #tpu.memory_space<vmem>>, %arg5: memref<1x5xf32, #tpu.memory_space<vmem>>, %arg6: memref<5x10xbf16, #tpu.memory_space<vmem>>, %arg7: memref<1x10xf32, #tpu.memory_space<vmem>>, %arg8: memref<16x10xf32, #tpu.memory_space<vmem>>) attributes {dimension_semantics = [#tpu.dimension_semantics<parallel>], iteration_bounds = array<i64: 1>, scalar_prefetch = 0 : i64, scratch_operands = 0 : i64, tpu.core_type = #tpu.core_type<tc>, window_params = [{transform_indices = @transform_0, window_bounds = array<i64: 16, 784>}, {pipeline_mode = #tpu.pipeline_mode<synchronous>, transform_indices = @transform_1, window_bounds = array<i64: 784, 5>}, {pipeline_mode = #tpu.pipeline_mode<synchronous>, transform_indices = @transform_2, window_bounds = array<i64: 1, 5>}, {pipeline_mode = #tpu.pipeline_mode<synchronous>, transform_indices = @transform_3, window_bounds = array<i64: 5, 5>}, {pipeline_mode = #tpu.pipeline_mode<synchronous>, transform_indices = @transform_4, window_bounds = array<i64: 1, 5>}, {pipeline_mode = #tpu.pipeline_mode<synchronous>, transform_indices = @transform_5, window_bounds = array<i64: 5, 10>}, {pipeline_mode = #tpu.pipeline_mode<synchronous>, transform_indices = @transform_6, window_bounds = array<i64: 1, 10>}, {transform_indices = @transform_7, window_bounds = array<i64: 16, 10>}]} {
    %c0 = arith.constant 0 : index
    %c0_0 = arith.constant 0 : index
    %0 = vector.load %arg1[%c0, %c0_0] : memref<16x784xf32, #tpu.memory_space<vmem>>, vector<16x784xf32>
    %1 = arith.truncf %0 : vector<16x784xf32> to vector<16x784xbf16>
    %c0_1 = arith.constant 0 : index
    %c0_2 = arith.constant 0 : index
    %2 = vector.load %arg2[%c0_1, %c0_2] : memref<784x5xbf16, #tpu.memory_space<vmem>>, vector<784x5xbf16>
    %cst = arith.constant dense<0.000000e+00> : vector<16x5xf32>
    %3 = tpu.matmul %1, %2, %cst {dimension_numbers = #tpu.dot_dimension_numbers<[1], [0], [0], [1], [0, 0, 1, 1], [], []>} : vector<16x784xbf16>, vector<784x5xbf16>, vector<16x5xf32> -> vector<16x5xf32>
    %c0_3 = arith.constant 0 : index
    %c0_4 = arith.constant 0 : index
    %4 = vector.load %arg3[%c0_3, %c0_4] : memref<1x5xf32, #tpu.memory_space<vmem>>, vector<1x5xf32>
    %5 = vector.broadcast %4 : vector<1x5xf32> to vector<16x5xf32>
    %6 = arith.addf %3, %5 : vector<16x5xf32>
    %cst_5 = arith.constant 0.000000e+00 : f32
    %7 = vector.broadcast %cst_5 : f32 to vector<16x5xf32>
    %8 = arith.maximumf %6, %7 : vector<16x5xf32>
    %9 = arith.truncf %8 : vector<16x5xf32> to vector<16x5xbf16>
    %c0_6 = arith.constant 0 : index
    %c0_7 = arith.constant 0 : index
    %10 = vector.load %arg4[%c0_6, %c0_7] : memref<5x5xbf16, #tpu.memory_space<vmem>>, vector<5x5xbf16>
    %cst_8 = arith.constant dense<0.000000e+00> : vector<16x5xf32>
    %11 = tpu.matmul %9, %10, %cst_8 {dimension_numbers = #tpu.dot_dimension_numbers<[1], [0], [0], [1], [0, 0, 1, 1], [], []>} : vector<16x5xbf16>, vector<5x5xbf16>, vector<16x5xf32> -> vector<16x5xf32>
    %c0_9 = arith.constant 0 : index
    %c0_10 = arith.constant 0 : index
    %12 = vector.load %arg5[%c0_9, %c0_10] : memref<1x5xf32, #tpu.memory_space<vmem>>, vector<1x5xf32>
    %13 = vector.broadcast %12 : vector<1x5xf32> to vector<16x5xf32>
    %14 = arith.addf %11, %13 : vector<16x5xf32>
    %cst_11 = arith.constant 0.000000e+00 : f32
    %15 = vector.broadcast %cst_11 : f32 to vector<16x5xf32>
    %16 = arith.maximumf %14, %15 : vector<16x5xf32>
    %17 = arith.truncf %16 : vector<16x5xf32> to vector<16x5xbf16>
    %c0_12 = arith.constant 0 : index
    %c0_13 = arith.constant 0 : index
    %18 = vector.load %arg6[%c0_12, %c0_13] : memref<5x10xbf16, #tpu.memory_space<vmem>>, vector<5x10xbf16>
    %cst_14 = arith.constant dense<0.000000e+00> : vector<16x10xf32>
    %19 = tpu.matmul %17, %18, %cst_14 {dimension_numbers = #tpu.dot_dimension_numbers<[1], [0], [0], [1], [0, 0, 1, 1], [], []>} : vector<16x5xbf16>, vector<5x10xbf16>, vector<16x10xf32> -> vector<16x10xf32>
    %c0_15 = arith.constant 0 : index
    %c0_16 = arith.constant 0 : index
    %20 = vector.load %arg7[%c0_15, %c0_16] : memref<1x10xf32, #tpu.memory_space<vmem>>, vector<1x10xf32>
    %21 = vector.broadcast %20 : vector<1x10xf32> to vector<16x10xf32>
    %22 = arith.addf %19, %21 : vector<16x10xf32>
    %c0_17 = arith.constant 0 : index
    %c0_18 = arith.constant 0 : index
    %23 = vector.load %arg8[%c0_17, %c0_18] : memref<16x10xf32, #tpu.memory_space<vmem>>, vector<16x10xf32>
    tpu.vector_store %arg8[%c0_17, %c0_18], %22 {strides = array<i32>} : memref<16x10xf32, #tpu.memory_space<vmem>>, vector<16x10xf32>,
    return
  }
  func.func @transform_0(%arg0: i32) -> (i32, i32) {
    %c0_i32 = arith.constant 0 : i32
    %c0_i32_0 = arith.constant 0 : i32
    return %arg0, %c0_i32 : i32, i32
  }
  func.func @transform_1(%arg0: i32) -> (i32, i32) {
    %c0_i32 = arith.constant 0 : i32
    %c0_i32_0 = arith.constant 0 : i32
    %c0_i32_1 = arith.constant 0 : i32
    return %c0_i32, %c0_i32_0 : i32, i32
  }
  func.func @transform_2(%arg0: i32) -> (i32, i32) {
    %c0_i32 = arith.constant 0 : i32
    %c0_i32_0 = arith.constant 0 : i32
    %c0_i32_1 = arith.constant 0 : i32
    return %c0_i32, %c0_i32_0 : i32, i32
  }
  func.func @transform_3(%arg0: i32) -> (i32, i32) {
    %c0_i32 = arith.constant 0 : i32
    %c0_i32_0 = arith.constant 0 : i32
    %c0_i32_1 = arith.constant 0 : i32
    return %c0_i32, %c0_i32_0 : i32, i32
  }
  func.func @transform_4(%arg0: i32) -> (i32, i32) {
    %c0_i32 = arith.constant 0 : i32
    %c0_i32_0 = arith.constant 0 : i32
    %c0_i32_1 = arith.constant 0 : i32
    return %c0_i32, %c0_i32_0 : i32, i32
  }
  func.func @transform_5(%arg0: i32) -> (i32, i32) {
    %c0_i32 = arith.constant 0 : i32
    %c0_i32_0 = arith.constant 0 : i32
    %c0_i32_1 = arith.constant 0 : i32
    return %c0_i32, %c0_i32_0 : i32, i32
  }
  func.func @transform_6(%arg0: i32) -> (i32, i32) {
    %c0_i32 = arith.constant 0 : i32
    %c0_i32_0 = arith.constant 0 : i32
    %c0_i32_1 = arith.constant 0 : i32
    return %c0_i32, %c0_i32_0 : i32, i32
  }
  func.func @transform_7(%arg0: i32) -> (i32, i32) {
    %c0_i32 = arith.constant 0 : i32
    %c0_i32_0 = arith.constant 0 : i32
    return %arg0, %c0_i32 : i32, i32
  }
}

</mosaic_0001>

<bundles_post_ra>
// kernel: tpu_custom_call.1
= control target key start
LH: loop header
LB: loop body
LE: loop exit
PB: predicated region body
PF: predicated region fallthrough
CT: control target
= control target key end

     0   :  { %s1161_s0 = inlined_call_operand.vmem [shape: f32[16,784], index: 0, kind: input, shape index: {}]   ;;  %s1162_s1 = inlined_call_operand.vmem [shape: bf16[784,5], index: 1, kind: input, shape index: {}]   ;;  %s1163_s2 = inlined_call_operand.vmem [shape: f32[1,5], index: 2, kind: input, shape index: {}]   ;;  %s1164_s3 = inlined_call_operand.vmem [shape: bf16[5,5], index: 3, kind: input, shape index: {}]   ;;  %s1165_s4 = inlined_call_operand.vmem [shape: f32[1,5], index: 4, kind: input, shape index: {}]   ;;  %s1166_s5 = inlined_call_operand.vmem [shape: bf16[5,10], index: 5, kind: input, shape index: {}]   ;;  %s1167_s6 = inlined_call_operand.vmem [shape: f32[1,10], index: 6, kind: input, shape index: {}]   ;;  %s1168_s7 = inlined_call_operand.hbm [shape: f32[16,10], index: 7, kind: output, shape index: {}]  }
   0x1   :  { %v835_v0 = vld [vmem:[%s1162_s1 + $0x38] sm:$0xff]  ;;  %v834_v4 = vld [vmem:[%s1162_s1 + $0x30] sm:$0xff]  ;;  %v833_v8 = vld [vmem:[%s1162_s1 + $0x28] sm:$0xff] }
   0x2   :  { %v843_v1 = vld [vmem:[%s1162_s1 + $0x78] sm:$0xff]  ;;  %449 = vmatpush.bf16.msra.mxu0 %v835_v0  ;;  %v842_v5 = vld [vmem:[%s1162_s1 + $0x70] sm:$0xff]  ;;  %v841_v9 = vld [vmem:[%s1162_s1 + $0x68] sm:$0xff] }
   0x3   :  { %v851_v2 = vld [vmem:[%s1162_s1 + $0xb8] sm:$0xff]  ;;  %463 = vmatpush.bf16.msra.mxu1 %v843_v1  ;;  %v850_v6 = vld [vmem:[%s1162_s1 + $0xb0] sm:$0xff]  ;;  %v849_v10 = vld [vmem:[%s1162_s1 + $0xa8] sm:$0xff] }
   0x4   :  { %v859_v3 = vld [vmem:[%s1162_s1 + $0xf8] sm:$0xff]  ;;  %477 = vmatpush.bf16.msra.mxu2 %v851_v2  ;;  %v858_v7 = vld [vmem:[%s1162_s1 + $0xf0] sm:$0xff]  ;;  %v857_v11 = vld [vmem:[%s1162_s1 + $0xe8] sm:$0xff] }
   0x5   :  { %491 = vmatpush.bf16.msra.mxu3 %v859_v3  ;;  %v832_v12 = vld [vmem:[%s1162_s1 + $0x20] sm:$0xff]  ;;  %v831_v16 = vld [vmem:[%s1162_s1 + $0x18] sm:$0xff]  ;;  %v830_v20 = vld [vmem:[%s1162_s1 + $0x10] sm:$0xff] }
   0x6   :  { %450 = vmatpush.bf16.msra.mxu0 %v834_v4  ;;  %v840_v13 = vld [vmem:[%s1162_s1 + $0x60] sm:$0xff]  ;;  %v839_v17 = vld [vmem:[%s1162_s1 + $0x58] sm:$0xff]  ;;  %v838_v21 = vld [vmem:[%s1162_s1 + $0x50] sm:$0xff] }
   0x7   :  { %464 = vmatpush.bf16.msra.mxu1 %v842_v5  ;;  %v848_v14 = vld [vmem:[%s1162_s1 + $0xa0] sm:$0xff]  ;;  %v847_v18 = vld [vmem:[%s1162_s1 + $0x98] sm:$0xff]  ;;  %v846_v22 = vld [vmem:[%s1162_s1 + $0x90] sm:$0xff] }
   0x8   :  { %478 = vmatpush.bf16.msra.mxu2 %v850_v6  ;;  %v856_v15 = vld [vmem:[%s1162_s1 + $0xe0] sm:$0xff]  ;;  %v855_v19 = vld [vmem:[%s1162_s1 + $0xd8] sm:$0xff]  ;;  %v854_v23 = vld [vmem:[%s1162_s1 + $0xd0] sm:$0xff] }
   0x9   :  { %492 = vmatpush.bf16.msra.mxu3 %v858_v7 }
   0xa   :  { %451 = vmatpush.bf16.msra.mxu0 %v833_v8 }
   0xb   :  { %465 = vmatpush.bf16.msra.mxu1 %v841_v9 }
   0xc   :  { %479 = vmatpush.bf16.msra.mxu2 %v849_v10 }
   0xd   :  { %493 = vmatpush.bf16.msra.mxu3 %v857_v11 }
   0xe   :  { %452 = vmatpush.bf16.msra.mxu0 %v832_v12 }
   0xf   :  { %466 = vmatpush.bf16.msra.mxu1 %v840_v13 }
  0x10   :  { %480 = vmatpush.bf16.msra.mxu2 %v848_v14 }
  0x11   :  { %494 = vmatpush.bf16.msra.mxu3 %v856_v15 }
  0x12   :  { %453 = vmatpush.bf16.msra.mxu0 %v831_v16 }
  0x13   :  { %467 = vmatpush.bf16.msra.mxu1 %v839_v17 }
  0x14   :  { %481 = vmatpush.bf16.msra.mxu2 %v847_v18 }
  0x15   :  { %495 = vmatpush.bf16.msra.mxu3 %v855_v19 }
  0x16   :  { %12 = vsyncpa [#allocation3], 0  ;;  %454 = vmatpush.bf16.msra.mxu0 %v830_v20  ;;  %v829_v24 = vld [vmem:[%s1162_s1 + $0x8] sm:$0xff]  ;;  %v828_v28 = vld [vmem:[%s1162_s1] sm:$0xff]  ;;  %vm445_vm0 = vcmask 130048   ;;  %vm559_vm1 = vcmask 1041408  }
  0x17   :  { %468 = vmatpush.bf16.msra.mxu1 %v838_v21  ;;  %v837_v25 = vld [vmem:[%s1162_s1 + $0x48] sm:$0xff]  ;;  %v836_v29 = vld [vmem:[%s1162_s1 + $0x40] sm:$0xff]  ;;  %v35_v31 = vld [vmem:[%s1161_s0 + $0x38] sm:$0xff]  ;;  %vm560_vm2 = vcmask 1042432   ;;  %v910_v7 = vmov 65535   ;;  %vm555_vm3 = vcmask 39936  }
  0x18   :  { %482 = vmatpush.bf16.msra.mxu2 %v846_v22  ;;  %v845_v26 = vld [vmem:[%s1162_s1 + $0x88] sm:$0xff]  ;;  %v28_v30 = vld [vmem:[%s1161_s0] sm:$0xff]  ;;  %v867_v34 = vld [vmem:[%s1162_s1 + $0x138] sm:$0xff]  ;;  %v561_v8 = vsel %vm559_vm1, 4294967295, %v910_v7  ;;  %vm608_vm4 = vcmask 80896   ;;  %s911_s17 = smov [#allocation2]  }
  0x19   :  { %496 = vmatpush.bf16.msra.mxu3 %v854_v23  ;;  %v853_v27 = vld [vmem:[%s1162_s1 + $0xc8] sm:$0xff]  ;;  %v36_v33 = vld [vmem:[%s1161_s0 + $0x40] sm:$0xff]  ;;  %v875_v35 = vld [vmem:[%s1162_s1 + $0x178] sm:$0xff]  ;;  %v42_v40 = vpack.c.bf16 %v35_v31, %v28_v30  ;;  %v562_v10 = vsel %vm560_vm2, %v561_v8, 0  ;;  %s615_s18 = sshll.u32 %s911_s17, 4  ;;  %s912_s21 = smov 128   ;;  %s616_s18 = int_to_ptr.vmem [resolvable:$true] %s615_s18 }
  0x1a   :  { %455 = vmatpush.bf16.msra.mxu0 %v829_v24  ;;  %v29_v32 = vld [vmem:[%s1161_s0 + $0x8] sm:$0xff]  ;;  %v844_v36 = vld [vmem:[%s1162_s1 + $0x80] sm:$0xff]  ;;  %v30_v38 = vld [vmem:[%s1161_s0 + $0x10] sm:$0xff]  ;;  %s913_s22 = smov 8  }
  0x1b   :  { %469 = vmatpush.bf16.msra.mxu1 %v837_v25  ;;  %v852_v37 = vld [vmem:[%s1162_s1 + $0xc0] sm:$0xff]  ;;  %v37_v39 = vld [vmem:[%s1161_s0 + $0x48] sm:$0xff]  ;;  %v31_v41 = vld [vmem:[%s1161_s0 + $0x18] sm:$0xff]  ;;  %v43_v43 = vpack.c.bf16 %v36_v33, %v29_v32 }
  0x1c   :  { %483 = vmatpush.bf16.msra.mxu2 %v845_v26  ;;  %v38_v42 = vld [vmem:[%s1161_s0 + $0x50] sm:$0xff]  ;;  %v876_v44 = vld [vmem:[%s1162_s1 + $0x180] sm:$0xff]  ;;  %v44_v47 = vpack.c.bf16 %v37_v39, %v30_v38  ;;  %v865_v49 = vld [vmem:[%s1162_s1 + $0x128] sm:$0xff] }
  0x1d   :  { %497 = vmatpush.bf16.msra.mxu3 %v853_v27  ;;  %v866_v45 = vld [vmem:[%s1162_s1 + $0x130] sm:$0xff]  ;;  %v45_v48 = vpack.c.bf16 %v38_v42, %v31_v41  ;;  %v873_v50 = vld [vmem:[%s1162_s1 + $0x168] sm:$0xff]  ;;  %v864_v51 = vld [vmem:[%s1162_s1 + $0x120] sm:$0xff] }
  0x1e   :  { %456 = vmatpush.bf16.msra.mxu0 %v828_v28  ;;  %v874_v46 = vld [vmem:[%s1162_s1 + $0x170] sm:$0xff]  ;;  %v872_v52 = vld [vmem:[%s1162_s1 + $0x160] sm:$0xff]  ;;  %v863_v53 = vld [vmem:[%s1162_s1 + $0x118] sm:$0xff] }
  0x1f   :  { %470 = vmatpush.bf16.msra.mxu1 %v836_v29  ;;  %v871_v54 = vld [vmem:[%s1162_s1 + $0x158] sm:$0xff]  ;;  %v34_v55 = vld [vmem:[%s1161_s0 + $0x30] sm:$0xff]  ;;  %v41_v56 = vld [vmem:[%s1161_s0 + $0x68] sm:$0xff] }
  0x20   :  { %484 = vmatpush.bf16.msra.mxu2 %v844_v36  ;;  %v862_v57 = vld [vmem:[%s1162_s1 + $0x110] sm:$0xff]  ;;  %v48_v59 = vpack.c.bf16 %v41_v56, %v34_v55  ;;  %v861_v60 = vld [vmem:[%s1162_s1 + $0x108] sm:$0xff]  ;;  %v860_v62 = vld [vmem:[%s1162_s1 + $0x100] sm:$0xff] }
  0x21   :  { %498 = vmatpush.bf16.msra.mxu3 %v852_v37  ;;  %457 = vmatmul.bf16.vlgmr.msra.gmra.mxu0 %v42_v40  ;;  %v870_v58 = vld [vmem:[%s1162_s1 + $0x150] sm:$0xff]  ;;  %v869_v61 = vld [vmem:[%s1162_s1 + $0x148] sm:$0xff]  ;;  %v868_v63 = vld [vmem:[%s1162_s1 + $0x140] sm:$0xff] }
  0x22   :  { %505 = vmatpush.bf16.msrb.mxu0 %v867_v34  ;;  %471 = vmatmul.bf16.vlgmr.msra.gmra.mxu1 %v43_v43  ;;  %v32_v0 = vld [vmem:[%s1161_s0 + $0x20] sm:$0xff]  ;;  %v39_v1 = vld [vmem:[%s1161_s0 + $0x58] sm:$0xff]  ;;  %v33_v2 = vld [vmem:[%s1161_s0 + $0x28] sm:$0xff] }
  0x23   :  { %519 = vmatpush.bf16.msrb.mxu1 %v875_v35  ;;  %485 = vmatmul.bf16.vlgmr.msra.gmra.mxu2 %v44_v47  ;;  %v40_v3 = vld [vmem:[%s1161_s0 + $0x60] sm:$0xff]  ;;  %v46_v4 = vpack.c.bf16 %v39_v1, %v32_v0 }
  0x24   :  { %540 = vmatpush.bf16.msrb.mxu2 %v876_v44  ;;  %499 = vmatmul.bf16.vlgmr.msra.gmra.mxu3 %v45_v48  ;;  %v47_v5 = vpack.c.bf16 %v40_v3, %v33_v2  ;;  %v550_v6 = vld [vmem:[%s1164_s3] sm:$0x7] }
  0x25   :  { %v583_v9 = vld [vmem:[%s1166_s5] sm:$0x7]  ;;  %v564_v11 = vand.u32 %v562_v10, %v550_v6 }
  0x26   :  { %506 = vmatpush.bf16.msrb.mxu0 %v866_v45  ;;  %v592_v12 = vand.u32 %v583_v9, %v562_v10  ;;  %v881_v16 = vld [vmem:[%s1163_s2] ss:$0 sm:$0xff] }
  0x27   :  { %520 = vmatpush.bf16.msrb.mxu1 %v874_v46  ;;  %573 = vmatpush.bf16.msrb.mxu3 %v564_v11  ;;  %v882_v46 = vld [vmem:[%s1165_s4] ss:$0 sm:$0xff]  ;;  %s617_s4 = sshll.u32 %s1168_s7, 4  ;;  %s618_s4 = int_to_ptr.hbm [resolvable:$true] %s617_s4 }
  0x28   :  { %601 = vmatpush.bf16.msra.mxu2 %v592_v12 }
  0x2a   :  { %507 = vmatpush.bf16.msrb.mxu0 %v865_v49 }
  0x2b   :  { %521 = vmatpush.bf16.msrb.mxu1 %v873_v50 }
  0x2e   :  { %508 = vmatpush.bf16.msrb.mxu0 %v864_v51 }
  0x2f   :  { %522 = vmatpush.bf16.msrb.mxu1 %v872_v52 }
  0x32   :  { %509 = vmatpush.bf16.msrb.mxu0 %v863_v53  ;;  %v883_v53 = vld [vmem:[%s1167_s6] ss:$0 sm:$0xff] }
  0x33   :  { %523 = vmatpush.bf16.msrb.mxu1 %v871_v54  ;;  %825 = vmatmul.msk.bf16.vlgmr.msrb.gmra.mxu2 %vm445_vm0, %v48_v59 }
  0x36   :  { %510 = vmatpush.bf16.msrb.mxu0 %v862_v57 }
  0x37   :  { %524 = vmatpush.bf16.msrb.mxu1 %v870_v58 }
  0x3a   :  { %511 = vmatpush.bf16.msrb.mxu0 %v861_v60 }
  0x3b   :  { %525 = vmatpush.bf16.msrb.mxu1 %v869_v61 }
  0x3e   :  { %512 = vmatpush.bf16.msrb.mxu0 %v860_v62 }
  0x3f   :  { %526 = vmatpush.bf16.msrb.mxu1 %v868_v63 }
  0x41   :  { %513 = vmatmul.bf16.vlgmr.msrb.gmra.mxu0 %v46_v4 }
  0x42   :  { %527 = vmatmul.bf16.vlgmr.msrb.gmra.mxu1 %v47_v5 }
  0x9e   :  { %v458_v13 = vpop.f32.mrf.mxu0 }
  0x9f   :  { %v472_v14 = vpop.f32.mrf.mxu1  ;;  %v459_v17 = vadd.f32 %v881_v16, %v458_v13 }
  0xa1   :  { %v473_v21 = vadd.f32 %v472_v14, %v459_v17 }
  0xa6   :  { %v486_v15 = vpop.f32.mrf.mxu2  ;;  %v460_v18 = vpop.f32.mrf.mxu0 }
  0xa7   :  { %v474_v19 = vpop.f32.mrf.mxu1  ;;  %v500_v22 = vpop.f32.mrf.mxu3  ;;  %v461_v23 = vadd.f32 %v881_v16, %v460_v18  ;;  %v487_v24 = vadd.f32 %v486_v15, %v473_v21 }
  0xa9   :  { %v475_v25 = vadd.f32 %v474_v19, %v461_v23  ;;  %v501_v28 = vadd.f32 %v500_v22, %v487_v24 }
  0xae   :  { %v488_v20 = vpop.f32.mrf.mxu2 }
  0xaf   :  { %v489_v30 = vadd.f32 %v488_v20, %v475_v25  ;;  %v502_v32 = vpop.f32.mrf.mxu3 }
  0xb1   :  { %v503_v33 = vadd.f32 %v502_v32, %v489_v30 }
  0xb6   :  { %v542_v29 = vpop.f32.mrf.mxu2 }
  0xbe   :  { %v514_v26 = vpop.f32.mrf.mxu0  ;;  %v544_v40 = vpop.f32.mrf.mxu2 }
  0xbf   :  { %v528_v27 = vpop.f32.mrf.mxu1  ;;  %v515_v31 = vadd.f32 %v514_v26, %v501_v28 }
  0xc1   :  { %v529_v34 = vadd.f32 %v528_v27, %v515_v31 }
  0xc3   :  { %v543_v38 = vadd.f32 %v542_v29, %v529_v34 }
  0xc5   :  { %v547_v42 = vmax.f32 %v543_v38, 0.0 }
  0xc6   :  { %v516_v35 = vpop.f32.mrf.mxu0 }
  0xc7   :  { %v517_v36 = vadd.f32 %v516_v35, %v503_v33  ;;  %v530_v37 = vpop.f32.mrf.mxu1 }
  0xc9   :  { %v531_v39 = vadd.f32 %v530_v37, %v517_v36 }
  0xcb   :  { %v545_v41 = vadd.f32 %v544_v40, %v531_v39 }
  0xcd   :  { %v548_v43 = vmax.f32 %v545_v41, 0.0 }
  0xcf   :  { %v549_v44 = vpack.c.bf16 %v548_v43, %v547_v42 }
  0xd1   :  { %826 = vmatmul.msk.bf16.vlgmr.msrb.gmra.mxu3 %vm555_vm3, %v549_v44 }
 0x154   :  { %v575_v45 = vpop.f32.mrf.mxu3 }
 0x155   :  { %v576_v47 = vadd.f32 %v882_v46, %v575_v45 }
 0x157   :  { %v580_v50 = vmax.f32 %v576_v47, 0.0 }
 0x15c   :  { %v577_v48 = vpop.f32.mrf.mxu3 }
 0x15d   :  { %v578_v49 = vadd.f32 %v882_v46, %v577_v48 }
 0x15f   :  { %v581_v51 = vmax.f32 %v578_v49, 0.0 }
 0x161   :  { %v582_v52 = vpack.c.bf16 %v581_v51, %v580_v50 }
 0x163   :  { %827 = vmatmul.msk.bf16.vlgmr.msra.gmra.mxu2 %vm555_vm3, %v582_v52 }
 0x1e6   :  { %v603_v54 = vpop.f32.mrf.mxu2 }
 0x1e7   :  { %v604_v55 = vadd.f32 %v883_v53, %v603_v54 }
 0x1e9   :  { %609 = vst.msk [vmem:[#allocation2] sm:$0xff] %vm608_vm4, %v604_v55 }
 0x1ee   :  { %v605_v56 = vpop.f32.mrf.mxu2 }
 0x1ef   :  { %v606_v57 = vadd.f32 %v883_v53, %v605_v56 }
 0x1f1   :  { %610 = vst.msk [vmem:[#allocation2 + $0x8] sm:$0xff] %vm608_vm4, %v606_v57 }
 0x1f2   :  { %623 = dma.vmem_to_hbm [thread:$0]  %s616_s18, 256, %s618_s4, [#allocation3], %s912_s21, %s912_s21, %s913_s22  }
 0x1f3   :  { %908 = dma.done.wait [#allocation3], 256  }
 0x1f4   :  { %909 = vsyncadd [#allocation3], 4294967040 }
 0x1f5   :  { %628 = vsyncpa [#allocation3], 1 }

</bundles_post_ra>
